<compile_context>
chip_gen: v7x
topology: tpu7x:2x2x1
jax: 0.10.0
libtpu: 0.0.40
codegen_flags: <defaults>
</compile_context>

<pallas_src>
import functools
import math

import jax
import jax.numpy as jnp
from jax.experimental import pallas as pl
from jax.experimental.pallas import tpu as pltpu


def _linear_kernel(x_ref, w_ref, b_ref, o_ref):
    # x_ref: (tm, Kf)   w_ref: (Kf, Nf)   b_ref: (1, Nf) f32   o_ref: (tm, Nf)
    acc = jnp.dot(x_ref[...], w_ref[...], preferred_element_type=jnp.float32)
    o_ref[...] = (acc + b_ref[...]).astype(o_ref.dtype)


def _round_up(x, m):
    return ((x + m - 1) // m) * m


def _choose_fold(m, n, max_fold=8):
    """Rows to fold so the folded output width n*fold is a multiple of 128."""
    fold = 128 // math.gcd(n, 128)
    if fold == 1:
        return 1
    if fold > max_fold or m % fold != 0:
        return 1  # fall back to masked (partial-lane) stores; still correct
    return fold


@functools.partial(jax.jit, static_argnames=("block_rows",))
def position_encoding_projector(x, weight_t, bias, *, block_rows=512):
    """y = x @ weight_t + bias over the last dim of x.

    x:        (..., input_size)
    weight_t: (input_size, output_size)   (= PyTorch weight.T)
    bias:     (output_size,)
    """
    in_size, out_size = weight_t.shape
    lead_shape = x.shape[:-1]
    m = 1
    for d in lead_shape:
        m *= d

    x2d = x.reshape(m, in_size)
    out_dtype = x.dtype

    # ---- lane-dense folding (layout plumbing only; no extra HBM pass) ----
    fold = _choose_fold(m, out_size)
    m_f = m // fold
    k_f = in_size * fold
    n_f = out_size * fold
    if fold > 1:
        x2d = x2d.reshape(m_f, k_f)                                  # free, contiguous
        w = jnp.kron(jnp.eye(fold, dtype=weight_t.dtype), weight_t)  # block-diag (k_f, n_f)
        b = jnp.tile(bias, fold)
    else:
        w = weight_t
        b = bias
    b2d = b.astype(jnp.float32).reshape(1, n_f)   # bias add stays in f32 in-kernel

    # ---- row-tile selection ----
    itemsize = jnp.dtype(x.dtype).itemsize
    row_align = max(8, 32 // itemsize)   # 8 f32 / 16 bf16 / 32 int8 sublane packing
    tm = _round_up(max(block_rows, row_align), row_align)
    # Keep >= 2 grid steps when there is enough work (v7x has 2 TensorCores).
    half = _round_up(max(pl.cdiv(m_f, 2), 1), row_align)
    tm = min(tm, half)
    grid_m = pl.cdiv(m_f, tm)

    # Deeper activation buffering only pays when the pipeline is deep enough.
    if grid_m >= 3:
        x_spec = pl.BlockSpec((tm, k_f), lambda i: (i, 0),
                              pipeline_mode=pl.Buffered(3))
        n_x_bufs = 3
    else:
        x_spec = pl.BlockSpec((tm, k_f), lambda i: (i, 0))
        n_x_bufs = 2

    # VMEM budget check (v7x: 64 MiB total, 32 MiB default scoped limit).
    w_bytes = k_f * n_f * jnp.dtype(w.dtype).itemsize
    out_itemsize = jnp.dtype(out_dtype).itemsize
    vmem_bytes = (n_x_bufs * tm * k_f * itemsize
                  + 2 * tm * n_f * out_itemsize
                  + 2 * w_bytes
                  + 2 * n_f * 4
                  + (2 << 20))             # slack for compiler scratch
    vmem_limit = min(vmem_bytes, 64 << 20) if vmem_bytes > (24 << 20) else None

    cost = pl.CostEstimate(
        flops=2 * m_f * k_f * n_f,
        transcendentals=0,
        bytes_accessed=(m_f * k_f * itemsize + w_bytes + n_f * 4
                        + m_f * n_f * out_itemsize),
    )

    out = pl.pallas_call(
        _linear_kernel,
        out_shape=jax.ShapeDtypeStruct((m_f, n_f), out_dtype),
        grid=(grid_m,),
        in_specs=[
            x_spec,                                        # activations (streamed)
            pl.BlockSpec((k_f, n_f), lambda i: (0, 0)),    # weight (VMEM-resident)
            pl.BlockSpec((1, n_f), lambda i: (0, 0)),      # bias   (VMEM-resident)
        ],
        out_specs=pl.BlockSpec((tm, n_f), lambda i: (i, 0)),
        compiler_params=pltpu.CompilerParams(
            dimension_semantics=("parallel",),
            vmem_limit_bytes=vmem_limit,
        ),
        cost_estimate=cost,
    )(x2d, w, b2d)

    # (m_f, n_f) row-major is bit-identical to (m, out_size) row-major.
    return out.reshape(*lead_shape, out_size)


def init_linear_params(key, input_size, output_size, dtype=jnp.float32):
    """Deterministic init matching nn.Linear's default (uniform +/- 1/sqrt(fan_in))."""
    kw, kb = jax.random.split(key)
    bound = 1.0 / (input_size ** 0.5)
    # Stored transposed: (input_size, output_size)
    weight_t = jax.random.uniform(
        kw, (input_size, output_size), dtype=dtype, minval=-bound, maxval=bound
    )
    bias = jax.random.uniform(
        kb, (output_size,), dtype=dtype, minval=-bound, maxval=bound
    )
    return weight_t, bias


if __name__ == "__main__":
    key = jax.random.PRNGKey(0)
    k_x, k_p = jax.random.split(key)

    batch, seq, input_size, output_size = 2, 8, 32, 64

    base_position_encoding = jax.random.normal(
        k_x, (batch, seq, input_size), dtype=jnp.float32
    )
    weight_t, bias = init_linear_params(k_p, input_size, output_size)

    y = position_encoding_projector(base_position_encoding, weight_t, bias)
    y = jax.block_until_ready(y)

    y_ref = base_position_encoding @ weight_t + bias
    assert y.shape == (batch, seq, output_size)
    assert jnp.allclose(y, y_ref, atol=1e-5, rtol=1e-5)

    # Extra checks (still small): multi-step grids, masked partial final
    # blocks (no explicit padding), the lane-dense fold path, the odd-row
    # fallback path, and the Buffered(3) pipeline path.
    for b2, s2 in [(2, 600), (2, 1200), (3, 37)]:
        kx2 = jax.random.fold_in(k_x, s2)
        x2 = jax.random.normal(kx2, (b2, s2, input_size), dtype=jnp.float32)
        y2 = jax.block_until_ready(
            position_encoding_projector(x2, weight_t, bias)
        )
        y2_ref = x2 @ weight_t + bias
        assert y2.shape == (b2, s2, output_size)
        assert jnp.allclose(y2, y2_ref, atol=1e-4, rtol=1e-4)

    print("KERNEL_OK")
</pallas_src>

<mosaic_0001>
module attributes {stable_mosaic.version = 11 : i64} {
  func.func @_linear_kernel(%arg0: i32, %arg1: memref<8x64xf32, #tpu.memory_space<vmem>>, %arg2: memref<64x128xf32, #tpu.memory_space<vmem>>, %arg3: memref<1x128xf32, #tpu.memory_space<vmem>>, %arg4: memref<8x128xf32, #tpu.memory_space<vmem>>) attributes {dimension_semantics = [#tpu.dimension_semantics<parallel>], iteration_bounds = array<i64: 1>, scalar_prefetch = 0 : i64, scratch_operands = 0 : i64, tpu.core_type = #tpu.core_type<tc>, window_params = [{transform_indices = @transform_0, window_bounds = array<i64: 8, 64>}, {pipeline_mode = #tpu.pipeline_mode<synchronous>, transform_indices = @transform_1, window_bounds = array<i64: 64, 128>}, {pipeline_mode = #tpu.pipeline_mode<synchronous>, transform_indices = @transform_2, window_bounds = array<i64: 1, 128>}, {transform_indices = @transform_3, window_bounds = array<i64: 8, 128>}]} {
    %c0 = arith.constant 0 : index
    %c0_0 = arith.constant 0 : index
    %0 = vector.load %arg1[%c0, %c0_0] : memref<8x64xf32, #tpu.memory_space<vmem>>, vector<8x64xf32>
    %c0_1 = arith.constant 0 : index
    %c0_2 = arith.constant 0 : index
    %1 = vector.load %arg2[%c0_1, %c0_2] : memref<64x128xf32, #tpu.memory_space<vmem>>, vector<64x128xf32>
    %cst = arith.constant dense<0.000000e+00> : vector<8x128xf32>
    %2 = tpu.matmul %0, %1, %cst {dimension_numbers = #tpu.dot_dimension_numbers<[1], [0], [0], [1], [0, 0, 1, 1], [], []>} : vector<8x64xf32>, vector<64x128xf32>, vector<8x128xf32> -> vector<8x128xf32>
    %c0_3 = arith.constant 0 : index
    %c0_4 = arith.constant 0 : index
    %3 = vector.load %arg3[%c0_3, %c0_4] : memref<1x128xf32, #tpu.memory_space<vmem>>, vector<1x128xf32>
    %4 = vector.broadcast %3 : vector<1x128xf32> to vector<8x128xf32>
    %5 = arith.addf %2, %4 : vector<8x128xf32>
    %c0_5 = arith.constant 0 : index
    %c0_6 = arith.constant 0 : index
    %6 = vector.load %arg4[%c0_5, %c0_6] : memref<8x128xf32, #tpu.memory_space<vmem>>, vector<8x128xf32>
    tpu.vector_store %arg4[%c0_5, %c0_6], %5 {strides = array<i32>} : memref<8x128xf32, #tpu.memory_space<vmem>>, vector<8x128xf32>,
    return
  }
  func.func @transform_0(%arg0: i32) -> (i32, i32) {
    %c0_i32 = arith.constant 0 : i32
    %c0_i32_0 = arith.constant 0 : i32
    return %arg0, %c0_i32 : i32, i32
  }
  func.func @transform_1(%arg0: i32) -> (i32, i32) {
    %c0_i32 = arith.constant 0 : i32
    %c0_i32_0 = arith.constant 0 : i32
    %c0_i32_1 = arith.constant 0 : i32
    return %c0_i32, %c0_i32_0 : i32, i32
  }
  func.func @transform_2(%arg0: i32) -> (i32, i32) {
    %c0_i32 = arith.constant 0 : i32
    %c0_i32_0 = arith.constant 0 : i32
    %c0_i32_1 = arith.constant 0 : i32
    return %c0_i32, %c0_i32_0 : i32, i32
  }
  func.func @transform_3(%arg0: i32) -> (i32, i32) {
    %c0_i32 = arith.constant 0 : i32
    %c0_i32_0 = arith.constant 0 : i32
    return %arg0, %c0_i32 : i32, i32
  }
}

</mosaic_0001>

<bundles_post_ra>
// kernel: tile.8
= control target key start
LH: loop header
LB: loop body
LE: loop exit
PB: predicated region body
PF: predicated region fallthrough
CT: control target
= control target key end

     0   :  { %s22_s0 = inlined_call_operand.vmem [shape: f32[64], index: 0, kind: input, shape index: {}]   ;;  %s23_s1 = inlined_call_operand.vmem [shape: f32[2,64], index: 1, kind: output, shape index: {}]  }
   0x1   :  { %v4_v0 = vld [vmem:[%s22_s0] ss:$0 sm:$0xff] }
   0x2   :  { %5 = vst [vmem:[%s23_s1] sm:$0x3] %v4_v0 }

// kernel: tile.9
= control target key start
LH: loop header
LB: loop body
LE: loop exit
PB: predicated region body
PF: predicated region fallthrough
CT: control target
= control target key end

     0   :  { %vm7_vm0 = vcmask 523264   ;;  %vm13_vm1 = vcmask 1048064   ;;  %s39_s0 = inlined_call_operand.vmem [shape: f32[2,64], index: 0, kind: input, shape index: {}]   ;;  %s40_s1 = inlined_call_operand.vmem [shape: f32[1,128], index: 1, kind: output, shape index: {}]  }
   0x1   :  { %v4_v0 = vld [vmem:[%s39_s0] sm:$0x3]  ;;  %s22_s0 = smov 64  }
   0x2   :  { %5 = vst [vmem:[#allocation1] sm:$0x3] %v4_v0 }
   0x9   :  { %v10_v1 = vld [vmem:[#allocation1 + $0x1] sm:$0x1]   ;;  %v6_v2 = vld [vmem:[#allocation1] sm:$0x1]  }
   0xa   :  { %11 = vrot.lane.b32.xlu0 %v10_v1, %s22_s0  ;;  %8 = vst.msk [vmem:[#allocation0] sm:$0x1] %vm7_vm0, %v6_v2  }
  0x7c   :  { %v12_v3 = vpop.permute.xlu0 %11  }
  0x7d   :  { %14 = vst.msk [vmem:[#allocation0] sm:$0x1] %vm13_vm1, %v12_v3  }
  0x84   :  { %v18_v4 = vld [vmem:[#allocation0] sm:$0x1] }
  0x85   :  { %20 = vst [vmem:[%s40_s1] sm:$0x1] %v18_v4 }

// kernel: position_encoding_projector.1
= control target key start
LH: loop header
LB: loop body
LE: loop exit
PB: predicated region body
PF: predicated region fallthrough
CT: control target
= control target key end

     0   :  { %v154_v0 = vmov 0.0|0.0   ;;  %vm155_vm0 = vmmov 0   ;;  %v156_v4 = vmov 0.0   ;;  %vm30_vm1 = vcmask 523264   ;;  %s210_s1 = inlined_call_operand.vmem [shape: f32[64,128], index: 1, kind: input, shape index: {}]   ;;  %s211_s0 = inlined_call_operand.vmem [shape: f32[8,64], index: 0, kind: input, shape index: {}]   ;;  %s212_s2 = inlined_call_operand.vmem [shape: f32[1,128], index: 2, kind: input, shape index: {}]   ;;  %s213_s3 = inlined_call_operand.vmem [shape: f32[8,128], index: 3, kind: output, shape index: {}]  }
   0x1   :  { %139 = vmatprep.subr.bf16.mxu0 %v154_v0  ;;  %v15_v1 = vld [vmem:[%s210_s1] sm:$0xff]  ;;  %v16_v2 = vld [vmem:[%s210_s1 + $0x8] sm:$0xff]  ;;  %v17_v3 = vld [vmem:[%s210_s1 + $0x10] sm:$0xff]  ;;  %136 = vmatprep.mubr.msk.f32.mxu0 %vm155_vm0, %v156_v4 }
   0x2   :  { %v140_v5 = vpack.c.bf16 %v16_v2, %v15_v1  ;;  %v18_v6 = vld [vmem:[%s210_s1 + $0x18] sm:$0xff]  ;;  %v19_v8 = vld [vmem:[%s210_s1 + $0x20] sm:$0xff]  ;;  %v20_v9 = vld [vmem:[%s210_s1 + $0x28] sm:$0xff] }
   0x3   :  { %v143_v7 = vpack.c.bf16 %v18_v6, %v17_v3  ;;  %v146_v10 = vpack.c.bf16 %v20_v9, %v19_v8  ;;  %v21_v11 = vld [vmem:[%s210_s1 + $0x30] sm:$0xff]  ;;  %v22_v12 = vld [vmem:[%s210_s1 + $0x38] sm:$0xff]  ;;  %v14_v14 = vld [vmem:[%s211_s0] sm:$0xff] }
   0x4   :  { %141 = vmatpush3.bf16.msra.mxu0 %v140_v5  ;;  %v149_v13 = vpack.c.bf16 %v22_v12, %v21_v11  ;;  %v109_v15 = vld [vmem:[%s212_s2] ss:$0 sm:$0xff] }
   0x5   :  { %142 = vmatprep.subr.bf16.mxu0 %v154_v0 }
   0x8   :  { %144 = vmatpush3.bf16.msra.mxu0 %v143_v7 }
   0x9   :  { %145 = vmatprep.subr.bf16.mxu0 %v154_v0 }
   0xc   :  { %147 = vmatpush3.bf16.msra.mxu0 %v146_v10 }
   0xd   :  { %148 = vmatprep.subr.bf16.mxu0 %v154_v0 }
  0x10   :  { %150 = vmatpush3.bf16.msra.mxu0 %v149_v13 }
  0x13   :  { %137 = vmatmul.mubr.msk.f32.vlgmr.msra.gmra.mrb[0].mxu0 %vm30_vm1, %v14_v14 }
  0xe6   :  { %v100_v16 = vpop.f32.mrb[0].mxu0 }
  0xe7   :  { %v101_v17 = vadd.f32 %v109_v15, %v100_v16  ;;  %v138_v18 = vpop.f32.mrb[1].mxu0 }
  0xe9   :  { %104 = vst [vmem:[%s213_s3] sm:$0xff] %v101_v17 }

</bundles_post_ra>
